<compile_context>
chip_gen: v7x
topology: tpu7x:2x2x1
jax: 0.10.0
libtpu: 0.0.40
codegen_flags: <defaults>
</compile_context>

<pallas_src>
import functools
from dataclasses import dataclass

import jax
import jax.numpy as jnp
from jax.experimental import pallas as pl
from jax.experimental.pallas import tpu as pltpu


@dataclass
class Config:
    model_dim: int = 32
    dropout: float = 0.1


# indices into the packed weight / bias slabs
W_EMB, W_C1, W_C2, W_C3, W_N1, W_N2, W_G1, W_G2 = range(8)


# ---------------------------------------------------------------------------
# Pallas kernel: whole forward hot path, one grid step
# ---------------------------------------------------------------------------
def gcn_healing_kernel(num_nodes, x_ref, a_ref, w_ref, b_ref, out_ref):
    """
    x_ref   : (Np, D)      node features, feature dim zero-padded F -> D
    a_ref   : (Np, Np)     dense normalized adjacency (self-loops included)
    w_ref   : (8, D, D)    pre-transposed weights W^T, zero-padded to (D, D)
    b_ref   : (8, D)       biases, zero-padded to D
    out_ref : (Np, OUT_W)  lane-dense output slab:
                [:, 0:D]    healed node features h
                [:, D:2D]   node-predictor output (first 13 cols valid)
                [:, 2D]     global prediction (broadcast over remaining lanes)
    """
    f32 = jnp.float32
    x = x_ref[...]
    a_hat = a_ref[...]
    w = w_ref[...]          # tiny slabs: load once, keep resident in vregs
    b = b_ref[...]

    np_pad, d = x.shape

    # node embedding (weights pre-transposed -> plain MXU matmul, no vxpose)
    h = jnp.dot(x, w[W_EMB], preferred_element_type=f32) + b[W_EMB:W_EMB + 1, :]

    # GCNConv layers: residual + ReLU (dropout = identity in eval mode)
    def gcn_layer(h, k):
        msg = jnp.dot(h, w[k], preferred_element_type=f32)                 # X W^T
        agg = jnp.dot(a_hat, msg, preferred_element_type=f32) + b[k:k + 1, :]
        return h + jnp.maximum(agg, 0.0)

    h = gcn_layer(h, W_C1)
    h = gcn_layer(h, W_C2)
    h = gcn_layer(h, W_C3)

    # node predictor head: Linear -> ReLU -> Linear (padded to D cols; 13 valid)
    hn = jnp.maximum(
        jnp.dot(h, w[W_N1], preferred_element_type=f32) + b[W_N1:W_N1 + 1, :], 0.0)
    node_preds = (
        jnp.dot(hn, w[W_N2], preferred_element_type=f32) + b[W_N2:W_N2 + 1, :])

    # global mean pool as a (1, Np) @ (Np, D) matmul (MXU) instead of a
    # sublane XLU reduction; padded rows masked out of the mean.
    col = jax.lax.broadcasted_iota(jnp.int32, (1, np_pad), 1)
    pool = jnp.where(col < num_nodes,
                     jnp.float32(1.0 / num_nodes), jnp.float32(0.0))
    g = jnp.dot(pool, h, preferred_element_type=f32)                       # (1, D)

    hg = jnp.maximum(
        jnp.dot(g, w[W_G1], preferred_element_type=f32) + b[W_G1:W_G1 + 1, :], 0.0)
    gp = jnp.dot(hg, w[W_G2], preferred_element_type=f32) + b[W_G2:W_G2 + 1, :]
    gpred = jax.nn.sigmoid(gp[:, 0:1])                                      # (1, 1)

    # single lane-dense full-width store -> one unmasked writeback
    rest = out_ref.shape[1] - 2 * d
    out_ref[...] = jnp.concatenate(
        [h, node_preds, jnp.broadcast_to(gpred, (np_pad, rest))], axis=1)


# ---------------------------------------------------------------------------
# Glue: dense normalized adjacency from edge_index (plain JAX, outside kernel)
# ---------------------------------------------------------------------------
def normalized_adjacency(edge_index, num_nodes, num_nodes_pad):
    src, dst = edge_index[0], edge_index[1]
    a = jnp.zeros((num_nodes_pad, num_nodes_pad), jnp.float32)
    a = a.at[dst, src].add(1.0)      # sum duplicates (matches GCNConv message sum)
    loop = (jnp.arange(num_nodes_pad) < num_nodes).astype(jnp.float32)
    a = a + jnp.diag(loop)           # self-loops for real nodes only
    deg = jnp.sum(a, axis=1)
    d_inv_sqrt = jnp.where(deg > 0.0,
                           jax.lax.rsqrt(jnp.maximum(deg, 1e-12)), 0.0)
    return d_inv_sqrt[:, None] * a * d_inv_sqrt[None, :]


# ---------------------------------------------------------------------------
# Host-side packing: pre-transpose and slab the 16 params into 2 arrays
# ---------------------------------------------------------------------------
def pack_params(params, feature_dim, model_dim):
    d = model_dim
    assert feature_dim <= d, "packing assumes feature_dim <= model_dim"

    def pad_t(w):                      # (out, in) -> W^T zero-padded to (d, d)
        wt = jnp.asarray(w, jnp.float32).T
        return jnp.pad(wt, ((0, d - wt.shape[0]), (0, d - wt.shape[1])))

    def pad_b(bv):                     # bias -> (d,) zero-padded
        bv = jnp.asarray(bv, jnp.float32).reshape(-1)
        return jnp.pad(bv, (0, d - bv.shape[0]))

    w_keys = ["w_emb", "w1", "w2", "w3", "wn1", "wn2", "wg1", "wg2"]
    b_keys = ["b_emb", "b1", "b2", "b3", "bn1", "bn2", "bg1", "bg2"]
    w_slab = jnp.stack([pad_t(params[k]) for k in w_keys])   # (8, d, d)
    b_slab = jnp.stack([pad_b(params[k]) for k in b_keys])   # (8, d)
    return w_slab, b_slab


# ---------------------------------------------------------------------------
# Wrapper
# ---------------------------------------------------------------------------
@functools.partial(jax.jit, static_argnames=("num_nodes", "model_dim"))
def gcn_healing_forward(x, edge_index, w_slab, b_slab, num_nodes, model_dim):
    d = model_dim
    n_pad = max(8, ((num_nodes + 7) // 8) * 8)          # sublane-multiple rows
    out_w = ((2 * d + 1 + 127) // 128) * 128            # lane-dense output slab

    x = jnp.asarray(x, jnp.float32)
    x_pad = jnp.zeros((n_pad, d), jnp.float32).at[:num_nodes, :x.shape[1]].set(x)
    a_hat = normalized_adjacency(edge_index, num_nodes, n_pad)

    flops = (2 * n_pad * d * d * 6              # emb + 3 conv feature + 2 node-head
             + 2 * 3 * n_pad * n_pad * d        # 3 adjacency aggregations
             + 2 * n_pad * d                    # mean pool matmul
             + 4 * d * d)                       # global head
    bytes_accessed = 4 * (x_pad.size + a_hat.size + w_slab.size + b_slab.size
                          + n_pad * out_w)

    vmem = pl.BlockSpec(memory_space=pltpu.MemorySpace.VMEM)
    out = pl.pallas_call(
        functools.partial(gcn_healing_kernel, num_nodes),
        out_shape=jax.ShapeDtypeStruct((n_pad, out_w), jnp.float32),
        in_specs=[vmem, vmem, vmem, vmem],
        out_specs=vmem,
        cost_estimate=pl.CostEstimate(
            flops=int(flops), transcendentals=1, bytes_accessed=int(bytes_accessed)),
    )(x_pad, a_hat, w_slab, b_slab)

    h = out[:num_nodes, :d]                      # healed node features
    node_preds = out[:num_nodes, d:d + 13]
    type_logits = node_preds[:, :10]
    pos_delta = node_preds[:, 10:]
    global_pred = out[0:1, 2 * d:2 * d + 1]      # (1, 1)
    return h, type_logits, pos_delta, global_pred


# ---------------------------------------------------------------------------
# Deterministic parameter construction (synthetic, not a checkpoint load)
# ---------------------------------------------------------------------------
def init_params(key, feature_dim, model_dim):
    ks = jax.random.split(key, 10)
    d, f = model_dim, feature_dim

    def lin(k, out_dim, in_dim):
        scale = 1.0 / jnp.sqrt(jnp.float32(in_dim))
        w = jax.random.uniform(k, (out_dim, in_dim), jnp.float32, -scale, scale)
        b = jnp.full((out_dim,), 0.01, jnp.float32)
        return w, b

    p = {}
    p["w_emb"], p["b_emb"] = lin(ks[0], d, f)
    p["w1"], p["b1"] = lin(ks[1], d, d)
    p["w2"], p["b2"] = lin(ks[2], d, d)
    p["w3"], p["b3"] = lin(ks[3], d, d)
    p["wn1"], p["bn1"] = lin(ks[4], d, d)
    p["wn2"], p["bn2"] = lin(ks[5], 13, d)
    p["wg1"], p["bg1"] = lin(ks[6], d // 2, d)
    p["wg2"], p["bg2"] = lin(ks[7], 1, d // 2)
    return p


if __name__ == "__main__":
    cfg = Config(model_dim=32, dropout=0.1)
    feature_dim = 16
    num_nodes = 8

    key = jax.random.PRNGKey(0)
    k_x, k_p = jax.random.split(key)

    x = jax.random.normal(k_x, (num_nodes, feature_dim), jnp.float32)
    # small ring graph (bidirectional): 8 nodes, 16 directed edges
    src = jnp.arange(num_nodes, dtype=jnp.int32)
    dst = (src + 1) % num_nodes
    edge_index = jnp.stack(
        [jnp.concatenate([src, dst]), jnp.concatenate([dst, src])], axis=0)

    params = init_params(k_p, feature_dim, cfg.model_dim)
    w_slab, b_slab = pack_params(params, feature_dim, cfg.model_dim)

    x_out, type_logits, pos_delta, global_pred = gcn_healing_forward(
        x, edge_index, w_slab, b_slab,
        num_nodes=num_nodes, model_dim=cfg.model_dim)
    jax.block_until_ready((x_out, type_logits, pos_delta, global_pred))

    assert x_out.shape == (num_nodes, cfg.model_dim)
    assert type_logits.shape == (num_nodes, 10)
    assert pos_delta.shape == (num_nodes, 3)
    assert global_pred.shape == (1, 1)
    print("KERNEL_OK")
</pallas_src>

<mosaic_0001>
module attributes {stable_mosaic.version = 11 : i64} {
  func.func private @main(%arg0: i32) attributes {dimension_semantics = [#tpu.dimension_semantics<core_parallel>], iteration_bounds = array<i64: 2>, tpu.core_type = #tpu.core_type<sc_scalar_subcore>, window_params = []} {
    return
  }
}

module attributes {stable_mosaic.version = 11 : i64} {
  func.func private @main(%arg0: i32) attributes {dimension_semantics = [#tpu.dimension_semantics<core_parallel>], iteration_bounds = array<i64: 2>, tpu.core_type = #tpu.core_type<sc_scalar_subcore>, window_params = []} {
    return
  }
}

module attributes {stable_mosaic.version = 11 : i64} {
  func.func @gcn_healing_kernel(%arg0: memref<8x32xf32, #tpu.memory_space<vmem>>, %arg1: memref<8x8xf32, #tpu.memory_space<vmem>>, %arg2: memref<8x32x32xf32, #tpu.memory_space<vmem>>, %arg3: memref<8x32xf32, #tpu.memory_space<vmem>>, %arg4: memref<8x128xf32, #tpu.memory_space<vmem>>) attributes {dimension_semantics = [], scalar_prefetch = 0 : i64, scratch_operands = 0 : i64, tpu.core_type = #tpu.core_type<tc>} {
    %c0 = arith.constant 0 : index
    %c0_0 = arith.constant 0 : index
    %0 = vector.load %arg0[%c0, %c0_0] : memref<8x32xf32, #tpu.memory_space<vmem>>, vector<8x32xf32>
    %c0_1 = arith.constant 0 : index
    %c0_2 = arith.constant 0 : index
    %1 = vector.load %arg1[%c0_1, %c0_2] : memref<8x8xf32, #tpu.memory_space<vmem>>, vector<8x8xf32>
    %c0_3 = arith.constant 0 : index
    %c0_4 = arith.constant 0 : index
    %c0_5 = arith.constant 0 : index
    %2 = vector.load %arg2[%c0_3, %c0_4, %c0_5] : memref<8x32x32xf32, #tpu.memory_space<vmem>>, vector<8x32x32xf32>
    %c0_6 = arith.constant 0 : index
    %c0_7 = arith.constant 0 : index
    %3 = vector.load %arg3[%c0_6, %c0_7] : memref<8x32xf32, #tpu.memory_space<vmem>>, vector<8x32xf32>
    %4 = vector.extract_strided_slice %2 {offsets = [0, 0, 0], sizes = [1, 32, 32], strides = [1, 1, 1]} : vector<8x32x32xf32> to vector<1x32x32xf32>
    %5 = vector.shape_cast %4 : vector<1x32x32xf32> to vector<32x32xf32>
    %cst = arith.constant dense<0.000000e+00> : vector<8x32xf32>
    %6 = tpu.matmul %0, %5, %cst {dimension_numbers = #tpu.dot_dimension_numbers<[1], [0], [0], [1], [0, 0, 1, 1], [], []>} : vector<8x32xf32>, vector<32x32xf32>, vector<8x32xf32> -> vector<8x32xf32>
    %7 = vector.extract_strided_slice %3 {offsets = [0, 0], sizes = [1, 32], strides = [1, 1]} : vector<8x32xf32> to vector<1x32xf32>
    %8 = vector.broadcast %7 : vector<1x32xf32> to vector<8x32xf32>
    %9 = arith.addf %6, %8 : vector<8x32xf32>
    %10 = vector.extract_strided_slice %2 {offsets = [1, 0, 0], sizes = [1, 32, 32], strides = [1, 1, 1]} : vector<8x32x32xf32> to vector<1x32x32xf32>
    %11 = vector.shape_cast %10 : vector<1x32x32xf32> to vector<32x32xf32>
    %cst_8 = arith.constant dense<0.000000e+00> : vector<8x32xf32>
    %12 = tpu.matmul %9, %11, %cst_8 {dimension_numbers = #tpu.dot_dimension_numbers<[1], [0], [0], [1], [0, 0, 1, 1], [], []>} : vector<8x32xf32>, vector<32x32xf32>, vector<8x32xf32> -> vector<8x32xf32>
    %cst_9 = arith.constant dense<0.000000e+00> : vector<8x32xf32>
    %13 = tpu.matmul %1, %12, %cst_9 {dimension_numbers = #tpu.dot_dimension_numbers<[1], [0], [0], [1], [0, 0, 1, 1], [], []>} : vector<8x8xf32>, vector<8x32xf32>, vector<8x32xf32> -> vector<8x32xf32>
    %14 = vector.extract_strided_slice %3 {offsets = [1, 0], sizes = [1, 32], strides = [1, 1]} : vector<8x32xf32> to vector<1x32xf32>
    %15 = vector.broadcast %14 : vector<1x32xf32> to vector<8x32xf32>
    %16 = arith.addf %13, %15 : vector<8x32xf32>
    %cst_10 = arith.constant 0.000000e+00 : f32
    %17 = vector.broadcast %cst_10 : f32 to vector<8x32xf32>
    %18 = arith.maximumf %16, %17 : vector<8x32xf32>
    %19 = arith.addf %9, %18 : vector<8x32xf32>
    %20 = vector.extract_strided_slice %2 {offsets = [2, 0, 0], sizes = [1, 32, 32], strides = [1, 1, 1]} : vector<8x32x32xf32> to vector<1x32x32xf32>
    %21 = vector.shape_cast %20 : vector<1x32x32xf32> to vector<32x32xf32>
    %cst_11 = arith.constant dense<0.000000e+00> : vector<8x32xf32>
    %22 = tpu.matmul %19, %21, %cst_11 {dimension_numbers = #tpu.dot_dimension_numbers<[1], [0], [0], [1], [0, 0, 1, 1], [], []>} : vector<8x32xf32>, vector<32x32xf32>, vector<8x32xf32> -> vector<8x32xf32>
    %cst_12 = arith.constant dense<0.000000e+00> : vector<8x32xf32>
    %23 = tpu.matmul %1, %22, %cst_12 {dimension_numbers = #tpu.dot_dimension_numbers<[1], [0], [0], [1], [0, 0, 1, 1], [], []>} : vector<8x8xf32>, vector<8x32xf32>, vector<8x32xf32> -> vector<8x32xf32>
    %24 = vector.extract_strided_slice %3 {offsets = [2, 0], sizes = [1, 32], strides = [1, 1]} : vector<8x32xf32> to vector<1x32xf32>
    %25 = vector.broadcast %24 : vector<1x32xf32> to vector<8x32xf32>
    %26 = arith.addf %23, %25 : vector<8x32xf32>
    %cst_13 = arith.constant 0.000000e+00 : f32
    %27 = vector.broadcast %cst_13 : f32 to vector<8x32xf32>
    %28 = arith.maximumf %26, %27 : vector<8x32xf32>
    %29 = arith.addf %19, %28 : vector<8x32xf32>
    %30 = vector.extract_strided_slice %2 {offsets = [3, 0, 0], sizes = [1, 32, 32], strides = [1, 1, 1]} : vector<8x32x32xf32> to vector<1x32x32xf32>
    %31 = vector.shape_cast %30 : vector<1x32x32xf32> to vector<32x32xf32>
    %cst_14 = arith.constant dense<0.000000e+00> : vector<8x32xf32>
    %32 = tpu.matmul %29, %31, %cst_14 {dimension_numbers = #tpu.dot_dimension_numbers<[1], [0], [0], [1], [0, 0, 1, 1], [], []>} : vector<8x32xf32>, vector<32x32xf32>, vector<8x32xf32> -> vector<8x32xf32>
    %cst_15 = arith.constant dense<0.000000e+00> : vector<8x32xf32>
    %33 = tpu.matmul %1, %32, %cst_15 {dimension_numbers = #tpu.dot_dimension_numbers<[1], [0], [0], [1], [0, 0, 1, 1], [], []>} : vector<8x8xf32>, vector<8x32xf32>, vector<8x32xf32> -> vector<8x32xf32>
    %34 = vector.extract_strided_slice %3 {offsets = [3, 0], sizes = [1, 32], strides = [1, 1]} : vector<8x32xf32> to vector<1x32xf32>
    %35 = vector.broadcast %34 : vector<1x32xf32> to vector<8x32xf32>
    %36 = arith.addf %33, %35 : vector<8x32xf32>
    %cst_16 = arith.constant 0.000000e+00 : f32
    %37 = vector.broadcast %cst_16 : f32 to vector<8x32xf32>
    %38 = arith.maximumf %36, %37 : vector<8x32xf32>
    %39 = arith.addf %29, %38 : vector<8x32xf32>
    %40 = vector.extract_strided_slice %2 {offsets = [4, 0, 0], sizes = [1, 32, 32], strides = [1, 1, 1]} : vector<8x32x32xf32> to vector<1x32x32xf32>
    %41 = vector.shape_cast %40 : vector<1x32x32xf32> to vector<32x32xf32>
    %cst_17 = arith.constant dense<0.000000e+00> : vector<8x32xf32>
    %42 = tpu.matmul %39, %41, %cst_17 {dimension_numbers = #tpu.dot_dimension_numbers<[1], [0], [0], [1], [0, 0, 1, 1], [], []>} : vector<8x32xf32>, vector<32x32xf32>, vector<8x32xf32> -> vector<8x32xf32>
    %43 = vector.extract_strided_slice %3 {offsets = [4, 0], sizes = [1, 32], strides = [1, 1]} : vector<8x32xf32> to vector<1x32xf32>
    %44 = vector.broadcast %43 : vector<1x32xf32> to vector<8x32xf32>
    %45 = arith.addf %42, %44 : vector<8x32xf32>
    %cst_18 = arith.constant 0.000000e+00 : f32
    %46 = vector.broadcast %cst_18 : f32 to vector<8x32xf32>
    %47 = arith.maximumf %45, %46 : vector<8x32xf32>
    %48 = vector.extract_strided_slice %2 {offsets = [5, 0, 0], sizes = [1, 32, 32], strides = [1, 1, 1]} : vector<8x32x32xf32> to vector<1x32x32xf32>
    %49 = vector.shape_cast %48 : vector<1x32x32xf32> to vector<32x32xf32>
    %cst_19 = arith.constant dense<0.000000e+00> : vector<8x32xf32>
    %50 = tpu.matmul %47, %49, %cst_19 {dimension_numbers = #tpu.dot_dimension_numbers<[1], [0], [0], [1], [0, 0, 1, 1], [], []>} : vector<8x32xf32>, vector<32x32xf32>, vector<8x32xf32> -> vector<8x32xf32>
    %51 = vector.extract_strided_slice %3 {offsets = [5, 0], sizes = [1, 32], strides = [1, 1]} : vector<8x32xf32> to vector<1x32xf32>
    %52 = vector.broadcast %51 : vector<1x32xf32> to vector<8x32xf32>
    %53 = arith.addf %50, %52 : vector<8x32xf32>
    %54 = tpu.iota {dimensions = array<i32: 1>} : vector<1x8xi32>
    %c8_i32 = arith.constant 8 : i32
    %55 = vector.broadcast %c8_i32 : i32 to vector<1x8xi32>
    %56 = arith.cmpi slt, %54, %55 : vector<1x8xi32>
    %cst_20 = arith.constant 1.250000e-01 : f32
    %cst_21 = arith.constant 0.000000e+00 : f32
    %57 = vector.broadcast %cst_20 : f32 to vector<1x8xf32>
    %58 = vector.broadcast %cst_21 : f32 to vector<1x8xf32>
    %59 = arith.select %56, %57, %58 : vector<1x8xi1>, vector<1x8xf32>
    %cst_22 = arith.constant dense<0.000000e+00> : vector<1x32xf32>
    %60 = tpu.matmul %59, %39, %cst_22 {dimension_numbers = #tpu.dot_dimension_numbers<[1], [0], [0], [1], [0, 0, 1, 1], [], []>} : vector<1x8xf32>, vector<8x32xf32>, vector<1x32xf32> -> vector<1x32xf32>
    %61 = vector.extract_strided_slice %2 {offsets = [6, 0, 0], sizes = [1, 32, 32], strides = [1, 1, 1]} : vector<8x32x32xf32> to vector<1x32x32xf32>
    %62 = vector.shape_cast %61 : vector<1x32x32xf32> to vector<32x32xf32>
    %cst_23 = arith.constant dense<0.000000e+00> : vector<1x32xf32>
    %63 = tpu.matmul %60, %62, %cst_23 {dimension_numbers = #tpu.dot_dimension_numbers<[1], [0], [0], [1], [0, 0, 1, 1], [], []>} : vector<1x32xf32>, vector<32x32xf32>, vector<1x32xf32> -> vector<1x32xf32>
    %64 = vector.extract_strided_slice %3 {offsets = [6, 0], sizes = [1, 32], strides = [1, 1]} : vector<8x32xf32> to vector<1x32xf32>
    %65 = arith.addf %63, %64 : vector<1x32xf32>
    %cst_24 = arith.constant 0.000000e+00 : f32
    %66 = vector.broadcast %cst_24 : f32 to vector<1x32xf32>
    %67 = arith.maximumf %65, %66 : vector<1x32xf32>
    %68 = vector.extract_strided_slice %2 {offsets = [7, 0, 0], sizes = [1, 32, 32], strides = [1, 1, 1]} : vector<8x32x32xf32> to vector<1x32x32xf32>
    %69 = vector.shape_cast %68 : vector<1x32x32xf32> to vector<32x32xf32>
    %cst_25 = arith.constant dense<0.000000e+00> : vector<1x32xf32>
    %70 = tpu.matmul %67, %69, %cst_25 {dimension_numbers = #tpu.dot_dimension_numbers<[1], [0], [0], [1], [0, 0, 1, 1], [], []>} : vector<1x32xf32>, vector<32x32xf32>, vector<1x32xf32> -> vector<1x32xf32>
    %71 = vector.extract_strided_slice %3 {offsets = [7, 0], sizes = [1, 32], strides = [1, 1]} : vector<8x32xf32> to vector<1x32xf32>
    %72 = arith.addf %70, %71 : vector<1x32xf32>
    %73 = vector.extract_strided_slice %72 {offsets = [0, 0], sizes = [1, 1], strides = [1, 1]} : vector<1x32xf32> to vector<1x1xf32>
    %74 = arith.negf %73 : vector<1x1xf32>
    %75 = math.exp %74 : vector<1x1xf32>
    %cst_26 = arith.constant 1.000000e+00 : f32
    %76 = vector.broadcast %cst_26 : f32 to vector<1x1xf32>
    %77 = arith.addf %76, %75 : vector<1x1xf32>
    %78 = arith.divf %76, %77 : vector<1x1xf32>
    %79 = vector.shape_cast %78 : vector<1x1xf32> to vector<1x1xf32>
    %80 = vector.broadcast %79 : vector<1x1xf32> to vector<8x64xf32>
    %81 = tpu.concatenate %39, %53, %80 in 1 : vector<8x32xf32>, vector<8x32xf32>, vector<8x64xf32> -> vector<8x128xf32>
    %c0_27 = arith.constant 0 : index
    %c0_28 = arith.constant 0 : index
    %82 = vector.load %arg4[%c0_27, %c0_28] : memref<8x128xf32, #tpu.memory_space<vmem>>, vector<8x128xf32>
    tpu.vector_store %arg4[%c0_27, %c0_28], %81 {strides = array<i32>} : memref<8x128xf32, #tpu.memory_space<vmem>>, vector<8x128xf32>,
    return
  }
}

</mosaic_0001>

<bundles_post_ra>
// kernel: gcn_healing_forward.1
= control target key start
LH: loop header
LB: loop body
LE: loop exit
PB: predicated region body
PF: predicated region fallthrough
CT: control target
= control target key end

     0   :  { %v1214_v0 = vmov 0.0|0.0   ;;  %vm1215_vm0 = vmmov 0   ;;  %v1216_v4 = vmov 0.0   ;;  %vm56_vm1 = vcmask 261120   ;;  %s1217_s27 = smov 32   ;;  %s1434_s2 = inlined_call_operand.vmem [shape: f32[8,32,32], index: 2, kind: input, shape index: {}]   ;;  %s1435_s0 = inlined_call_operand.vmem [shape: f32[8,32], index: 0, kind: input, shape index: {}]   ;;  %s1436_s3 = inlined_call_operand.vmem [shape: f32[8,32], index: 3, kind: input, shape index: {}]   ;;  %s1437_s1 = inlined_call_operand.vmem [shape: f32[8,8], index: 1, kind: input, shape index: {}]   ;;  %s1438_s4 = inlined_call_operand.vmem [shape: f32[8,128], index: 4, kind: output, shape index: {}]  }
   0x1   :  { %1156 = vmatprep.subr.bf16.mxu0 %v1214_v0  ;;  %v19_v1 = vld [vmem:[%s1434_s2] sm:$0xff]  ;;  %v20_v2 = vld [vmem:[%s1434_s2 + $0x8] sm:$0xff]  ;;  %v21_v3 = vld [vmem:[%s1434_s2 + $0x10] sm:$0xff]  ;;  %1056 = vmatprep.mubr.msk.f32.mxu0 %vm1215_vm0, %v1216_v4  ;;  %v52_v15 = vlaneseq  ;;  %vm207_vm2 = vcmask 64512   ;;  %vm980_vm4 = vcmask 523264  }
   0x2   :  { %v1157_v5 = vpack.c.bf16 %v20_v2, %v19_v1  ;;  %v22_v6 = vld [vmem:[%s1434_s2 + $0x18] sm:$0xff]  ;;  %1162 = vmatprep.subr.bf16.mxu1 %v1214_v0  ;;  %v23_v7 = vld [vmem:[%s1434_s2 + $0x20] sm:$0xff]  ;;  %1067 = vmatprep.mubr.msk.f32.mxu1 %vm1215_vm0, %v1216_v4  ;;  %v24_v8 = vld [vmem:[%s1434_s2 + $0x28] sm:$0xff] }
   0x3   :  { %v1160_v9 = vpack.c.bf16 %v22_v6, %v21_v3  ;;  %v1163_v10 = vpack.c.bf16 %v24_v8, %v23_v7  ;;  %v17_v11 = vld [vmem:[%s1435_s0] sm:$0xff]  ;;  %v25_v12 = vld [vmem:[%s1434_s2 + $0x30] sm:$0xff]  ;;  %v26_v13 = vld [vmem:[%s1434_s2 + $0x38] sm:$0xff]  ;;  %v1284_v16 = vshrl.u32 %v52_v15, 7  ;;  %v737_v8 = vand.u32 127, %v52_v15 }
   0x4   :  { %1158 = vmatpush3.bf16.msra.mxu0 %v1157_v5  ;;  %v1166_v14 = vpack.c.bf16 %v26_v13, %v25_v12  ;;  %v1290_v18 = vld [vmem:[%s1436_s3] sm:$0xff]  ;;  %v28_v27 = vld [vmem:[%s1434_s2 + $0x48] sm:$0xff]  ;;  %v29_v29 = vld [vmem:[%s1434_s2 + $0x50] sm:$0xff] }
   0x5   :  { %1159 = vmatprep.subr.bf16.mxu0 %v1214_v0  ;;  %1164 = vmatpush3.bf16.msra.mxu1 %v1163_v10  ;;  %v54_v17 = vsub.s32 0, %v1284_v16  ;;  %v18_v23 = vld [vmem:[%s1437_s1] sm:$0xff]  ;;  %v30_v30 = vld [vmem:[%s1434_s2 + $0x58] sm:$0xff]  ;;  %v205_v32 = vsub.s32 1, %v1284_v16  ;;  %v32_v42 = vld [vmem:[%s1434_s2 + $0x68] sm:$0xff]  ;;  %v358_v47 = vsub.s32 2, %v1284_v16 }
   0x6   :  { %1165 = vmatprep.subr.bf16.mxu1 %v1214_v0  ;;  %v27_v26 = vld [vmem:[%s1434_s2 + $0x40] sm:$0xff]  ;;  %v1172_v31 = vpack.c.bf16 %v30_v30, %v29_v29  ;;  %v33_v44 = vld [vmem:[%s1434_s2 + $0x70] sm:$0xff]  ;;  %v34_v45 = vld [vmem:[%s1434_s2 + $0x78] sm:$0xff]  ;;  %v507_v2 = vsub.s32 3, %v1284_v16  ;;  %vm738_vm3 = vcmp.lt.s32.totalorder %v737_v8, 8  ;;  %v583_v15 = vsub.s32 4, %v1284_v16 }
   0x7   :  { %v55_v19 = vrot.slane %v1290_v18, %v54_v17  ;;  %v1169_v28 = vpack.c.bf16 %v28_v27, %v27_v26  ;;  %v206_v33 = vrot.slane %v1290_v18, %v205_v32  ;;  %v31_v41 = vld [vmem:[%s1434_s2 + $0x60] sm:$0xff]  ;;  %v1178_v46 = vpack.c.bf16 %v34_v45, %v33_v44  ;;  %v36_v55 = vld [vmem:[%s1434_s2 + $0x88] sm:$0xff]  ;;  %v37_v59 = vld [vmem:[%s1434_s2 + $0x90] sm:$0xff] }
   0x8   :  { %1161 = vmatpush3.bf16.msra.mxu0 %v1160_v9  ;;  %v1175_v43 = vpack.c.bf16 %v32_v42, %v31_v41  ;;  %v359_v48 = vrot.slane %v1290_v18, %v358_v47  ;;  %v35_v54 = vld [vmem:[%s1434_s2 + $0x80] sm:$0xff]  ;;  %v38_v60 = vld [vmem:[%s1434_s2 + $0x98] sm:$0xff]  ;;  %v40_v63 = vld [vmem:[%s1434_s2 + $0xa8] sm:$0xff]  ;;  %v508_v3 = vrot.slane %v1290_v18, %v507_v2  ;;  %v584_v17 = vrot.slane %v1290_v18, %v583_v15 }
   0x9   :  { %1070 = vmatprep.subr.mxu0 %v1216_v4  ;;  %1167 = vmatpush3.bf16.msra.mxu1 %v1166_v14  ;;  %v1181_v56 = vpack.c.bf16 %v36_v55, %v35_v54  ;;  %v1184_v61 = vpack.c.bf16 %v38_v60, %v37_v59  ;;  %v39_v62 = vld [vmem:[%s1434_s2 + $0xa0] sm:$0xff]  ;;  %v41_v12 = vld [vmem:[%s1434_s2 + $0xb0] sm:$0xff]  ;;  %v42_v13 = vld [vmem:[%s1434_s2 + $0xb8] sm:$0xff]  ;;  %v890_v45 = vrot.slane %v1290_v18, 7 }
   0xa   :  { %1168 = vmatprep.subr.bf16.mxu1 %v1214_v0  ;;  %v1187_v1 = vpack.c.bf16 %v40_v63, %v39_v62  ;;  %v1190_v14 = vpack.c.bf16 %v42_v13, %v41_v12  ;;  %v45_v26 = vld [vmem:[%s1434_s2 + $0xd0] sm:$0xff]  ;;  %v46_v27 = vld [vmem:[%s1434_s2 + $0xd8] sm:$0xff]  ;;  %v48_v32 = vld [vmem:[%s1434_s2 + $0xe8] sm:$0xff] }
   0xb   :  { %1057 = vmatmul.mubr.msk.f32.vlgmr.msra.gmra.mrb[0].mxu0 %vm56_vm1, %v17_v11  ;;  %v739_v11 = vsel %vm738_vm3, 0.125, %v1216_v4  ;;  %v1196_v30 = vpack.c.bf16 %v46_v27, %v45_v26 }
   0xc   :  { %1072 = vmatprep.mubr.msk.f32.mxu0 %vm1215_vm0, %v1216_v4 }
  0xde   :  { %v126_v20 = vpop.f32.mrb[0].mxu0 }
  0xdf   :  { %v127_v21 = vadd.f32 %v126_v20, %v55_v19  ;;  %v1058_v22 = vpop.f32.mrb[1].mxu0  ;;  %v43_v19 = vld [vmem:[%s1434_s2 + $0xc0] sm:$0xff]  ;;  %v44_v20 = vld [vmem:[%s1434_s2 + $0xc8] sm:$0xff] }
  0xe1   :  { %1068 = vmatmul.mubr.msk.f32.vlgmr.msra.gmra.mrb[0].mxu1 %vm56_vm1, %v127_v21 }
  0xe2   :  { %1083 = vmatprep.mubr.msk.f32.mxu1 %vm1215_vm0, %v1216_v4  ;;  %1170 = vmatpush3.bf16.msra.mxu1 %v1169_v28 }
  0xe3   :  { %1171 = vmatprep.subr.bf16.mxu1 %v1214_v0 }
  0xe6   :  { %1173 = vmatpush3.bf16.msra.mxu1 %v1172_v31  ;;  %v47_v31 = vld [vmem:[%s1434_s2 + $0xe0] sm:$0xff] }
  0xe7   :  { %1102 = vmatprep.subr.mxu1 %v1216_v4 }
 0x1b4   :  { %v199_v24 = vpop.f32.mrb[0].mxu1 }
 0x1b5   :  { %v1069_v25 = vpop.f32.mrb[1].mxu1  ;;  %1071 = vmatpush3.msra.mxu0 %v199_v24  ;;  %v1193_v24 = vpack.c.bf16 %v44_v20, %v43_v19 }
 0x1b6   :  { %1073 = vmatmul.mubr.msk.f32.vlgmr.msra.gmra.mrb[2].mxu0 %vm207_vm2, %v18_v23  ;;  %1086 = vmatprep.subr.mxu0 %v1216_v4 }
 0x1b7   :  { %1088 = vmatprep.mubr.msk.f32.mxu0 %vm1215_vm0, %v1216_v4 }
 0x289   :  { %v277_v34 = vpop.f32.mrb[2].mxu0 }
 0x28a   :  { %v278_v35 = vadd.f32 %v277_v34, %v206_v33  ;;  %v1074_v36 = vpop.f32.mrb[3].mxu0  ;;  %v1199_v33 = vpack.c.bf16 %v48_v32, %v47_v31  ;;  %v50_v34 = vld [vmem:[%s1434_s2 + $0xf8] sm:$0xff] }
 0x28b   :  { %v661_v36 = vsub.s32 5, %v1284_v16 }
 0x28c   :  { %v281_v37 = vmax.f32 %v278_v35, 0.0 }
 0x28e   :  { %v282_v38 = vadd.f32 %v281_v37, %v127_v21  ;;  %v662_v37 = vrot.slane %v1290_v18, %v661_v36 }
 0x290   :  { %1084 = vmatmul.mubr.msk.f32.vlgmr.msra.gmra.mrb[2].mxu1 %vm56_vm1, %v282_v38 }
 0x291   :  { %1104 = vmatprep.mubr.msk.f32.mxu1 %vm1215_vm0, %v1216_v4 }
 0x363   :  { %v352_v39 = vpop.f32.mrb[2].mxu1 }
 0x364   :  { %v1085_v40 = vpop.f32.mrb[3].mxu1  ;;  %1087 = vmatpush3.msra.mxu0 %v352_v39 }
 0x365   :  { %1089 = vmatmul.mubr.msk.f32.vlgmr.msra.gmra.mrb[4].mxu0 %vm207_vm2, %v18_v23  ;;  %1174 = vmatprep.subr.bf16.mxu0 %v1214_v0 }
 0x366   :  { %1099 = vmatprep.mubr.msk.f32.mxu0 %vm1215_vm0, %v1216_v4  ;;  %1176 = vmatpush3.bf16.msra.mxu0 %v1175_v43 }
 0x367   :  { %1177 = vmatprep.subr.bf16.mxu0 %v1214_v0 }
 0x36a   :  { %1179 = vmatpush3.bf16.msra.mxu0 %v1178_v46 }
 0x36b   :  { %1186 = vmatprep.subr.bf16.mxu0 %v1214_v0 }
 0x438   :  { %v426_v49 = vpop.f32.mrb[4].mxu0 }
 0x439   :  { %v427_v50 = vadd.f32 %v426_v49, %v359_v48  ;;  %v1090_v51 = vpop.f32.mrb[5].mxu0 }
 0x43b   :  { %v430_v52 = vmax.f32 %v427_v50, 0.0 }
 0x43d   :  { %v431_v53 = vadd.f32 %v430_v52, %v282_v38 }
 0x43f   :  { %1100 = vmatmul.mubr.msk.f32.vlgmr.msra.gmra.mrb[6].mxu0 %vm56_vm1, %v431_v53 }
 0x440   :  { %1126 = vmatprep.mubr.msk.f32.mxu0 %vm1215_vm0, %v1216_v4  ;;  %1188 = vmatpush3.bf16.msra.mxu0 %v1187_v1 }
 0x441   :  { %1189 = vmatprep.subr.bf16.mxu0 %v1214_v0 }
 0x444   :  { %1191 = vmatpush3.bf16.msra.mxu0 %v1190_v14 }
 0x445   :  { %1192 = vmatprep.subr.bf16.mxu0 %v1214_v0 }
 0x512   :  { %v501_v57 = vpop.f32.mrb[6].mxu0 }
 0x513   :  { %v1101_v58 = vpop.f32.mrb[7].mxu0  ;;  %1103 = vmatpush3.msra.mxu1 %v501_v57 }
 0x514   :  { %1105 = vmatmul.mubr.msk.f32.vlgmr.msra.gmra.mrb[4].mxu1 %vm207_vm2, %v18_v23  ;;  %1180 = vmatprep.subr.bf16.mxu1 %v1214_v0 }
 0x515   :  { %1182 = vmatpush3.bf16.msra.mxu1 %v1181_v56  ;;  %1115 = vmatprep.mubr.msk.f32.mxu1 %vm1215_vm0, %v1216_v4 }
 0x516   :  { %1183 = vmatprep.subr.bf16.mxu1 %v1214_v0 }
 0x519   :  { %1185 = vmatpush3.bf16.msra.mxu1 %v1184_v61 }
 0x51a   :  { %1129 = vmatprep.subr.mxu1 %v1216_v4 }
 0x5e7   :  { %v575_v5 = vpop.f32.mrb[4].mxu1 }
 0x5e8   :  { %v576_v6 = vadd.f32 %v575_v5, %v508_v3  ;;  %v1106_v7 = vpop.f32.mrb[5].mxu1 }
 0x5ea   :  { %v579_v9 = vmax.f32 %v576_v6, 0.0 }
 0x5ec   :  { %v1373_v10 = vadd.f32 %v579_v9, %v431_v53 }
 0x5ee   :  { %1116 = vmatmul.mubr.msk.f32.vlgmr.msra.gmra.mrb[6].mxu1 %vm56_vm1, %v1373_v10 }
 0x5ef   :  { %1130 = vmatpush3.msra.mxu1 %v1373_v10  ;;  %1131 = vmatprep.mubr.msk.f32.mxu1 %vm1215_vm0, %v1216_v4 }
 0x5f0   :  { %1198 = vmatprep.subr.bf16.mxu1 %v1214_v0 }
 0x5f2   :  { %1132 = vmatmul.mubr.msk.f32.vlgmr.msra.gmra.mrb[8].mxu1 %vm207_vm2, %v739_v11 }
 0x5f3   :  { %1153 = vmatprep.mubr.msk.f32.mxu1 %vm1215_vm0, %v1216_v4  ;;  %1200 = vmatpush3.bf16.msra.mxu1 %v1199_v33 }
 0x5f4   :  { %1201 = vmatprep.subr.bf16.mxu1 %v1214_v0 }
 0x6c1   :  { %v654_v21 = vpop.f32.mrb[6].mxu1 }
 0x6c2   :  { %v655_v22 = vadd.f32 %v654_v21, %v584_v17  ;;  %v1117_v23 = vpop.f32.mrb[7].mxu1 }
 0x6c4   :  { %v658_v25 = vmax.f32 %v655_v22, 0.0 }
 0x6c5   :  { %v809_v28 = vpop.f32.mrb[8].mxu1 }
 0x6c6   :  { %1127 = vmatmul.mubr.msk.f32.vlgmr.msra.gmra.mrb[8].mxu0 %vm56_vm1, %v658_v25  ;;  %v1133_v29 = vpop.f32.mrb[9].mxu1 }
 0x6c7   :  { %1194 = vmatpush3.bf16.msra.mxu0 %v1193_v24  ;;  %1142 = vmatprep.mubr.msk.f32.mxu0 %vm1215_vm0, %v1216_v4  ;;  %v49_v4 = vld [vmem:[%s1434_s2 + $0xf0] sm:$0xff] }
 0x6c8   :  { %1195 = vmatprep.subr.bf16.mxu0 %v1214_v0  ;;  %v1202_v35 = vpack.c.bf16 %v50_v34, %v49_v4  ;;  %v814_v0 = vrot.slane %v1290_v18, 6 }
 0x6ca   :  { %1203 = vmatpush3.bf16.msra.mxu1 %v1202_v35 }
 0x6cb   :  { %1197 = vmatpush3.bf16.msra.mxu0 %v1196_v30 }
 0x6ce   :  { %1143 = vmatmul.mubr.msk.f32.vlgmr.msra.gmra.mrb[10].mxu0 %vm56_vm1, %v809_v28 }
 0x799   :  { %v732_v38 = vpop.f32.mrb[8].mxu0 }
 0x79a   :  { %v733_v39 = vadd.f32 %v732_v38, %v662_v37  ;;  %v1128_v40 = vpop.f32.mrb[9].mxu0 }
 0x79c   :  { %976 = vrot.lane.b32.xlu0 %v733_v39, %s1217_s27 }
 0x7a1   :  { %v885_v41 = vpop.f32.mrb[10].mxu0 }
 0x7a2   :  { %v886_v42 = vadd.f32 %v885_v41, %v814_v0  ;;  %v1144_v43 = vpop.f32.mrb[11].mxu0 }
 0x7a4   :  { %v889_v44 = vmax.f32 %v886_v42, 0.0 }
 0x7a6   :  { %1154 = vmatmul.mubr.msk.f32.vlgmr.msra.gmra.mrb[10].mxu1 %vm56_vm1, %v889_v44 }
 0x80e   :  { %v977_v52 = vpop.permute.xlu0 %976 }
 0x80f   :  { %v979_v53 = vsel %vm56_vm1, %v1373_v10, %v977_v52 }
 0x879   :  { %v961_v46 = vpop.f32.mrb[10].mxu1 }
 0x87a   :  { %v962_v47 = vadd.f32 %v961_v46, %v890_v45  ;;  %v1155_v16 = vpop.f32.mrb[11].mxu1 }
 0x87c   :  { %v999_v48 = vmul.f32 -1.442695, %v962_v47 }
 0x87e   :  { %1210 = vpow2.f32 %v999_v48 }
 0x888   :  { %v1211_v49 = vpop.eup %1210 }
 0x889   :  { %v968_v50 = vadd.f32 1.0, %v1211_v49 }
 0x88b   :  { %1212 = vrcp.f32 %v968_v50 }
 0x895   :  { %v1213_v51 = vpop.eup %1212 }
 0x896   :  { %1204 = vpush %v1213_v51 }
 0x8c7   :  { %s1205_s2 = spop %1204 }
 0x8c8   :  { %v973_v54 = vstv %s1205_s2 }
 0x8c9   :  { %v981_v55 = vsel %vm980_vm4, %v979_v53, %v973_v54 }
 0x8ca   :  { %982 = vst [vmem:[%s1438_s4] sm:$0xff] %v981_v55 }

</bundles_post_ra>
